<compile_context>
chip_gen: v7x
topology: tpu7x:2x2x1
jax: 0.10.0
libtpu: 0.0.40
codegen_flags: <defaults>
</compile_context>

<pallas_src>
import functools

import numpy as np

import jax
import jax.numpy as jnp
from jax.experimental import pallas as pl
from jax.experimental.pallas import tpu as pltpu

# ------------------------------------------------------------------ constants
C_EEG = 62            # EEG channels (x[:, :, :62, :])
C_EYE = 4             # eye channels (x[:, :, 62:, :])
T_IN = 68             # time samples -> flattened EEGNet feature = 16*17 = 272
F1 = 8                # temporal filters
F2 = 16               # spatial / separable filters
KT = 9                # temporal kernel size ('same')
KT2 = 5               # separable temporal kernel size ('same')
PAD1 = (KT - 1) // 2  # 4
PAD2 = (KT2 - 1) // 2 # 2
T2 = T_IN // 2        # 34
T3 = T_IN // 4        # 17
FEAT = F2 * T3        # 272, matches flf = Linear(272, 2)
N_CLASSES = 2
LANE = 128            # per-batch-element lane block
MAX_BT = 32           # raised from 8: no quadratic-in-bt structure remains

# Layout invariants that make the cross-block roll wrap safe for bt > 1:
#   * input occupies lanes [PAD1, PAD1+T_IN) of each 128-lane block; valid stage-1
#     conv output lives at lanes [0, 2*T2); left-rolls by k<=KT-1 only wrap foreign
#     data into lanes >= LANE-(KT-1), never read.
#   * after masking, `pooled` is nonzero only at even lanes [0, 2*T2); the +/-2,+/-4
#     stage-2 rolls therefore wrap only zeros into the low lanes, and wfin reads only
#     lanes {4s, 4s+2 : s < T3} <= 66.
assert PAD1 + T_IN <= LANE
assert 2 * T2 <= LANE - (KT - 1)
assert 2 * T2 <= LANE - 2 * PAD2
assert 4 * (T3 - 1) + 2 < 2 * T2


# ------------------------------------------------------------------ kernel helpers
def _elu(x):
    # nn.ELU(alpha=1.0); exp only on the clamped negative branch (robust to large x).
    return jnp.where(x > 0, x, jnp.exp(jnp.minimum(x, 0.0)) - 1.0)


def _roll(x, shift, lanes):
    """jnp.roll-style lane rotation (positive shift -> toward higher lane index).

    Normalized to a non-negative static amount; wrapped lanes land in per-block
    columns that are never read downstream (see layout invariants above)."""
    s = shift % lanes
    if s == 0:
        return x
    return pltpu.roll(x, shift=s, axis=1)


def _make_kernel(bt, f2t):
    lanes = bt * LANE

    def kernel(x_ref, w1_ref, b2_ref, w34_ref, b4_ref,
               pmask_ref, wfin_ref, ones_ref, bflf_ref, o_ref):
        # ---- block 1: temporal+spatial conv, pre-folded weights, branches block-diag.
        y = jnp.dot(w1_ref[...], x_ref[...],
                    preferred_element_type=jnp.float32)          # (KT*f2t, lanes)
        acc = y[0:f2t, :]                                         # k = 0 term, no roll
        for k in range(1, KT):
            acc = acc + _roll(y[k * f2t:(k + 1) * f2t, :], -k, lanes)
        h = _elu(acc + b2_ref[...])                               # f32

        # ---- avg-pool(1,2): strided (results at even lanes); mask carries the 0.5
        # factor and zeroes padding/garbage lanes (re-creates stage-2 'same' padding).
        pooled = (h + _roll(h, -1, lanes)) * pmask_ref[...]       # (f2t, lanes)

        # ---- block 2: depthwise+pointwise conv (folded), stride-2 shift-add.
        y2 = jnp.dot(w34_ref[...], pooled.astype(jnp.bfloat16),
                     preferred_element_type=jnp.float32)          # (KT2*f2t, lanes)
        acc2 = _roll(y2[0:f2t, :], 2 * PAD2, lanes)               # k = 0 term
        for k in range(1, KT2):
            acc2 = acc2 + _roll(y2[k * f2t:(k + 1) * f2t, :],
                                2 * PAD2 - 2 * k, lanes)
        p = _elu(acc2 + b4_ref[...])                              # f32

        # ---- avg-pool(1,2) + flatten + flf folded into wfin (stride-4 columns);
        # per-element block sum via a small bf16 MXU matmul (v5e: no f32 MXU passes).
        ones_b = ones_ref[...]
        wfin = wfin_ref[...]
        rows = []
        for c in range(N_CLASSES):                                # static, 2 classes
            prod = (p * wfin[c * f2t:(c + 1) * f2t, :]).astype(jnp.bfloat16)
            bs = jnp.dot(prod, ones_b,
                         preferred_element_type=jnp.float32)      # (f2t, bt)
            rows.append(jnp.sum(bs, axis=0, keepdims=True))       # (1, bt)
        o_ref[...] = jnp.concatenate(rows, axis=0) + bflf_ref[...]

    return kernel


# ------------------------------------------------------------------ wrapper-side prep
def _prep_x(x, lo, hi):
    """(B,1,66,T) -> (C, B*128) bf16, each element's T samples at columns
    [PAD1, PAD1+T) of its own 128-lane block (zeros give 'same' conv padding)."""
    xs = x[:, 0, lo:hi, :]                                              # (B, C, T)
    xp = jnp.pad(xs, ((0, 0), (0, 0), (PAD1, LANE - T_IN - PAD1)))      # (B, C, 128)
    return jnp.transpose(xp, (1, 0, 2)).reshape(hi - lo, -1).astype(jnp.bfloat16)


def _fold_branch(p):
    """Fold one EEGNet branch into two stacked MXU weights + biases."""
    # Wc[k] = sum_f1 w1[f1,k] * w2[f1];  b2' = b2 + sum_f1 b1[f1]*sum_c w2[f1,:,c]
    wc = jnp.einsum("fk,fgc->kgc", p["w1"], p["w2"])                    # (KT, F2, C)
    b2p = p["b2"] + (p["b1"][:, None] * jnp.sum(p["w2"], axis=-1)).sum(0)[:, None]
    # W34[k] = w4 * w3[:, k];  b4' = b4 + w4 @ b3
    w34 = p["w4"][None, :, :] * jnp.transpose(p["w3"])[:, None, :]      # (KT2, F2, F2)
    b4p = p["b4"] + p["w4"] @ p["b3"]
    return wc, b2p, w34, b4p


def _stack_branches(branches):
    """Block-diagonally stack 1 or 2 folded branches (mod==3 branch fusion)."""
    nb = len(branches)
    f2t = nb * F2
    c_tot = sum(c for _, c in branches)
    folded = [_fold_branch(p) for p, _ in branches]
    w1_full = jnp.zeros((KT, f2t, c_tot), jnp.float32)
    w34_full = jnp.zeros((KT2, f2t, f2t), jnp.float32)
    c_off = 0
    for n, ((wc, _, w34, _), (_, cn)) in enumerate(zip(folded, branches)):
        w1_full = w1_full.at[:, n * F2:(n + 1) * F2, c_off:c_off + cn].set(wc)
        w34_full = w34_full.at[:, n * F2:(n + 1) * F2, n * F2:(n + 1) * F2].set(w34)
        c_off += cn
    b2p = jnp.concatenate([f[1] for f in folded], axis=0).astype(jnp.float32)
    b4p = jnp.concatenate([f[3] for f in folded], axis=0).astype(jnp.float32)
    return (w1_full.reshape(KT * f2t, c_tot).astype(jnp.bfloat16), b2p,
            w34_full.reshape(KT2 * f2t, f2t).astype(jnp.bfloat16), b4p)


def _pool_mask(bt):
    """(1, bt*128) f32: 0.5 at even lanes [0, 2*T2) of each block, else 0."""
    m = np.zeros((1, LANE), np.float32)
    m[0, 0:2 * T2:2] = 0.5
    return jnp.asarray(np.tile(m, (1, bt)), jnp.float32)


def _block_sum_matrix(bt):
    """(bt*128, bt) bf16: per-element lane-block sum as one MXU matmul."""
    m = np.zeros((bt * LANE, bt), np.float32)
    for b in range(bt):
        m[b * LANE:(b + 1) * LANE, b] = 1.0
    return jnp.asarray(m, jnp.bfloat16)


def _fold_final_linear(w_lin, nb, bt):
    """avg-pool(1,2) + flatten + Linear(272,2) folded onto the stride-4 lane layout."""
    w = jnp.transpose(w_lin).reshape(N_CLASSES, F2, T3)                 # (2, 16, 17)
    blk = jnp.zeros((N_CLASSES, F2, LANE), jnp.float32)
    s4 = 4 * np.arange(T3)
    blk = blk.at[:, :, s4].set(0.5 * w)
    blk = blk.at[:, :, s4 + 2].set(0.5 * w)
    blk = jnp.tile(blk, (1, nb, bt))                                    # (2, f2t, lanes)
    return blk.reshape(N_CLASSES * nb * F2, bt * LANE)


def _choose_bt(b):
    """Largest tile <= MAX_BT that still leaves >=2 grid steps (v7x: 2 TensorCores)."""
    if b == 1:
        return 1
    for bt in range(min(b // 2, MAX_BT), 0, -1):
        if b % bt == 0:
            return bt
    return 1


def _fused_forward(xf, w1s, b2p, w34s, b4p, w_lin, b_lin, nb, batch, bt):
    g = batch // bt
    lanes = bt * LANE
    f2t = nb * F2
    c_tot = xf.shape[0]
    pmask = _pool_mask(bt)
    ones_blk = _block_sum_matrix(bt)
    wfin = _fold_final_linear(w_lin, nb, bt)
    bflf = jnp.reshape(b_lin, (N_CLASSES, 1)).astype(jnp.float32)

    out = pl.pallas_call(
        _make_kernel(bt, f2t),
        out_shape=jax.ShapeDtypeStruct((g, N_CLASSES, bt), jnp.float32),
        grid=(g,),
        in_specs=[
            pl.BlockSpec((c_tot, lanes), lambda i: (0, i)),              # x (batch tile)
            pl.BlockSpec((KT * f2t, c_tot), lambda i: (0, 0)),           # stage-1 W
            pl.BlockSpec((f2t, 1), lambda i: (0, 0)),                    # b2'
            pl.BlockSpec((KT2 * f2t, f2t), lambda i: (0, 0)),            # stage-2 W
            pl.BlockSpec((f2t, 1), lambda i: (0, 0)),                    # b4'
            pl.BlockSpec((1, lanes), lambda i: (0, 0)),                  # pool mask
            pl.BlockSpec((N_CLASSES * f2t, lanes), lambda i: (0, 0)),    # folded flf
            pl.BlockSpec((lanes, bt), lambda i: (0, 0)),                 # block-sum ones
            pl.BlockSpec((N_CLASSES, 1), lambda i: (0, 0)),              # flf bias
        ],
        out_specs=pl.BlockSpec((None, N_CLASSES, bt), lambda i: (i, 0, 0)),
        compiler_params=pltpu.CompilerParams(
            dimension_semantics=("parallel",),
            vmem_limit_bytes=32 * 1024 * 1024),
    )(xf, w1s, b2p, w34s, b4p, pmask, wfin, ones_blk, bflf)
    return jnp.transpose(out, (0, 2, 1)).reshape(batch, N_CLASSES)


@functools.partial(jax.jit, static_argnums=1)
def trans_eegnet_forward(x, mod, params):
    """Mirrors TransEEGNet.forward(x, mod). `mod` is a static Python int."""
    if mod not in (1, 2, 3):
        raise ValueError("mod must be 1, 2 or 3")
    batch = x.shape[0]
    bt = _choose_bt(batch)
    if mod == 1:
        branches = [(params["eegnet1"], C_EEG)]
        lo, hi = 0, C_EEG
        w_lin, b_lin = params["flf_w"], params["flf_b"]
    elif mod == 2:
        branches = [(params["eegnet2"], C_EYE)]
        lo, hi = C_EEG, C_EEG + C_EYE
        w_lin, b_lin = params["flf2_w"], params["flf2_b"]
    else:  # mod == 3: both branches fused block-diagonally in one kernel
        branches = [(params["eegnet1"], C_EEG), (params["eegnet2"], C_EYE)]
        lo, hi = 0, C_EEG + C_EYE
        w_lin, b_lin = params["flf_w"], params["flf_b"]
    xf = _prep_x(x, lo, hi)
    w1s, b2p, w34s, b4p = _stack_branches(branches)
    return _fused_forward(xf, w1s, b2p, w34s, b4p, w_lin, b_lin,
                          len(branches), batch, bt)


# ------------------------------------------------------------------ pure-JAX reference
def _reference_eegnet(xs, p):
    b, c, t = xs.shape
    xp = jnp.pad(xs, ((0, 0), (0, 0), (PAD1, PAD1)))
    acc = jnp.zeros((b, F2, t), jnp.float32)
    for f1 in range(F1):
        y = jnp.zeros((b, c, t), jnp.float32)
        for k in range(KT):
            y = y + p["w1"][f1, k] * xp[:, :, k:k + t]
        y = y + p["b1"][f1]
        acc = acc + jnp.einsum("gc,bct->bgt", p["w2"][f1], y)
    acc = acc + p["b2"][None]
    h = _elu(acc)
    h = 0.5 * (h[:, :, 0::2] + h[:, :, 1::2])
    t2 = t // 2
    hp = jnp.pad(h, ((0, 0), (0, 0), (PAD2, PAD2)))
    d = jnp.zeros((b, F2, t2), jnp.float32)
    for k in range(KT2):
        d = d + p["w3"][:, k][None, :, None] * hp[:, :, k:k + t2]
    d = d + p["b3"][None]
    q = _elu(jnp.einsum("gf,bft->bgt", p["w4"], d) + p["b4"][None])
    return 0.5 * (q[:, :, 0::2] + q[:, :, 1::2])


@functools.partial(jax.jit, static_argnums=1)
def reference_forward(x, mod, params):
    b = x.shape[0]
    if mod == 1:
        f = _reference_eegnet(x[:, 0, :C_EEG, :], params["eegnet1"])
        return f.reshape(b, -1) @ params["flf_w"] + params["flf_b"]
    if mod == 2:
        f = _reference_eegnet(x[:, 0, C_EEG:, :], params["eegnet2"])
        return f.reshape(b, -1) @ params["flf2_w"] + params["flf2_b"]
    f1 = _reference_eegnet(x[:, 0, :C_EEG, :], params["eegnet1"])
    f2 = _reference_eegnet(x[:, 0, C_EEG:, :], params["eegnet2"])
    return (f1 + f2).reshape(b, -1) @ params["flf_w"] + params["flf_b"]


# ------------------------------------------------------------------ deterministic params
def _init_eegnet_params(key, c):
    ks = jax.random.split(key, 8)
    s = 0.15
    return {
        "w1": jax.random.normal(ks[0], (F1, KT), jnp.float32) * s,
        "b1": jax.random.normal(ks[1], (F1,), jnp.float32) * s,
        "w2": jax.random.normal(ks[2], (F1, F2, c), jnp.float32) * s,
        "b2": jax.random.normal(ks[3], (F2, 1), jnp.float32) * s,
        "w3": jax.random.normal(ks[4], (F2, KT2), jnp.float32) * s,
        "b3": jax.random.normal(ks[5], (F2, 1), jnp.float32) * s,
        "w4": jax.random.normal(ks[6], (F2, F2), jnp.float32) * s,
        "b4": jax.random.normal(ks[7], (F2, 1), jnp.float32) * s,
    }


def init_params(key):
    k1, k2, k3, k4, k5 = jax.random.split(key, 5)
    return {
        "eegnet1": _init_eegnet_params(k1, C_EEG),
        "eegnet2": _init_eegnet_params(k2, C_EYE),
        "flf_w": jax.random.normal(k3, (FEAT, N_CLASSES), jnp.float32) * 0.1,
        "flf_b": jax.random.normal(k5, (1, N_CLASSES), jnp.float32) * 0.1,
        "flf2_w": jax.random.normal(k4, (FEAT, N_CLASSES), jnp.float32) * 0.1,
        "flf2_b": jnp.zeros((1, N_CLASSES), jnp.float32),
    }


# ------------------------------------------------------------------ main
if __name__ == "__main__":
    key = jax.random.PRNGKey(0)
    kx, kp = jax.random.split(key)
    params = init_params(kp)

    # B=2 exercises bt=1; B=8 exercises bt=4 (cross-block roll-wrap invariant).
    for batch, mods in ((2, (1, 2, 3)), (8, (3,))):
        x = jax.random.normal(jax.random.fold_in(kx, batch),
                              (batch, 1, C_EEG + C_EYE, T_IN), jnp.float32)
        for m in mods:
            out = jax.block_until_ready(trans_eegnet_forward(x, m, params))
            ref = reference_forward(x, m, params)
            assert out.shape == (batch, N_CLASSES)
            assert bool(jnp.all(jnp.isfinite(out)))
            assert bool(jnp.allclose(out, ref, atol=5e-2, rtol=1e-1)), (
                batch, m, np.asarray(out), np.asarray(ref))
    print("KERNEL_OK")
</pallas_src>

<mosaic_0001>
module attributes {stable_mosaic.version = 11 : i64} {
  func.func @kernel(%arg0: i32, %arg1: memref<62x128xbf16, #tpu.memory_space<vmem>>, %arg2: memref<144x62xbf16, #tpu.memory_space<vmem>>, %arg3: memref<16x1xf32, #tpu.memory_space<vmem>>, %arg4: memref<80x16xbf16, #tpu.memory_space<vmem>>, %arg5: memref<16x1xf32, #tpu.memory_space<vmem>>, %arg6: memref<1x128xf32, #tpu.memory_space<vmem>>, %arg7: memref<32x128xf32, #tpu.memory_space<vmem>>, %arg8: memref<128x1xbf16, #tpu.memory_space<vmem>>, %arg9: memref<2x1xf32, #tpu.memory_space<vmem>>, %arg10: memref<1x2x1xf32, #tpu.memory_space<vmem>>) attributes {dimension_semantics = [#tpu.dimension_semantics<parallel>], iteration_bounds = array<i64: 2>, scalar_prefetch = 0 : i64, scratch_operands = 0 : i64, tpu.core_type = #tpu.core_type<tc>, window_params = [{transform_indices = @transform_0, window_bounds = array<i64: 62, 128>}, {pipeline_mode = #tpu.pipeline_mode<synchronous>, transform_indices = @transform_1, window_bounds = array<i64: 144, 62>}, {pipeline_mode = #tpu.pipeline_mode<synchronous>, transform_indices = @transform_2, window_bounds = array<i64: 16, 1>}, {pipeline_mode = #tpu.pipeline_mode<synchronous>, transform_indices = @transform_3, window_bounds = array<i64: 80, 16>}, {pipeline_mode = #tpu.pipeline_mode<synchronous>, transform_indices = @transform_4, window_bounds = array<i64: 16, 1>}, {pipeline_mode = #tpu.pipeline_mode<synchronous>, transform_indices = @transform_5, window_bounds = array<i64: 1, 128>}, {pipeline_mode = #tpu.pipeline_mode<synchronous>, transform_indices = @transform_6, window_bounds = array<i64: 32, 128>}, {pipeline_mode = #tpu.pipeline_mode<synchronous>, transform_indices = @transform_7, window_bounds = array<i64: 128, 1>}, {pipeline_mode = #tpu.pipeline_mode<synchronous>, transform_indices = @transform_8, window_bounds = array<i64: 2, 1>}, {transform_indices = @transform_9, window_bounds = array<i64: 1, 2, 1>}]} {
    %c0 = arith.constant 0 : index
    %c0_0 = arith.constant 0 : index
    %0 = vector.load %arg2[%c0, %c0_0] : memref<144x62xbf16, #tpu.memory_space<vmem>>, vector<144x62xbf16>
    %c0_1 = arith.constant 0 : index
    %c0_2 = arith.constant 0 : index
    %1 = vector.load %arg1[%c0_1, %c0_2] : memref<62x128xbf16, #tpu.memory_space<vmem>>, vector<62x128xbf16>
    %cst = arith.constant dense<0.000000e+00> : vector<144x128xf32>
    %2 = tpu.matmul %0, %1, %cst {dimension_numbers = #tpu.dot_dimension_numbers<[1], [0], [0], [1], [0, 0, 1, 1], [], []>} : vector<144x62xbf16>, vector<62x128xbf16>, vector<144x128xf32> -> vector<144x128xf32>
    %3 = vector.extract_strided_slice %2 {offsets = [0, 0], sizes = [16, 128], strides = [1, 1]} : vector<144x128xf32> to vector<16x128xf32>
    %4 = vector.extract_strided_slice %2 {offsets = [16, 0], sizes = [16, 128], strides = [1, 1]} : vector<144x128xf32> to vector<16x128xf32>
    %c127_i32 = arith.constant 127 : i32
    %5 = tpu.dynamic_rotate %4 by %c127_i32 dim 1 : vector<16x128xf32>, i32 -> vector<16x128xf32>
    %6 = arith.addf %3, %5 : vector<16x128xf32>
    %7 = vector.extract_strided_slice %2 {offsets = [32, 0], sizes = [16, 128], strides = [1, 1]} : vector<144x128xf32> to vector<16x128xf32>
    %c126_i32 = arith.constant 126 : i32
    %8 = tpu.dynamic_rotate %7 by %c126_i32 dim 1 : vector<16x128xf32>, i32 -> vector<16x128xf32>
    %9 = arith.addf %6, %8 : vector<16x128xf32>
    %10 = vector.extract_strided_slice %2 {offsets = [48, 0], sizes = [16, 128], strides = [1, 1]} : vector<144x128xf32> to vector<16x128xf32>
    %c125_i32 = arith.constant 125 : i32
    %11 = tpu.dynamic_rotate %10 by %c125_i32 dim 1 : vector<16x128xf32>, i32 -> vector<16x128xf32>
    %12 = arith.addf %9, %11 : vector<16x128xf32>
    %13 = vector.extract_strided_slice %2 {offsets = [64, 0], sizes = [16, 128], strides = [1, 1]} : vector<144x128xf32> to vector<16x128xf32>
    %c124_i32 = arith.constant 124 : i32
    %14 = tpu.dynamic_rotate %13 by %c124_i32 dim 1 : vector<16x128xf32>, i32 -> vector<16x128xf32>
    %15 = arith.addf %12, %14 : vector<16x128xf32>
    %16 = vector.extract_strided_slice %2 {offsets = [80, 0], sizes = [16, 128], strides = [1, 1]} : vector<144x128xf32> to vector<16x128xf32>
    %c123_i32 = arith.constant 123 : i32
    %17 = tpu.dynamic_rotate %16 by %c123_i32 dim 1 : vector<16x128xf32>, i32 -> vector<16x128xf32>
    %18 = arith.addf %15, %17 : vector<16x128xf32>
    %19 = vector.extract_strided_slice %2 {offsets = [96, 0], sizes = [16, 128], strides = [1, 1]} : vector<144x128xf32> to vector<16x128xf32>
    %c122_i32 = arith.constant 122 : i32
    %20 = tpu.dynamic_rotate %19 by %c122_i32 dim 1 : vector<16x128xf32>, i32 -> vector<16x128xf32>
    %21 = arith.addf %18, %20 : vector<16x128xf32>
    %22 = vector.extract_strided_slice %2 {offsets = [112, 0], sizes = [16, 128], strides = [1, 1]} : vector<144x128xf32> to vector<16x128xf32>
    %c121_i32 = arith.constant 121 : i32
    %23 = tpu.dynamic_rotate %22 by %c121_i32 dim 1 : vector<16x128xf32>, i32 -> vector<16x128xf32>
    %24 = arith.addf %21, %23 : vector<16x128xf32>
    %25 = vector.extract_strided_slice %2 {offsets = [128, 0], sizes = [16, 128], strides = [1, 1]} : vector<144x128xf32> to vector<16x128xf32>
    %c120_i32 = arith.constant 120 : i32
    %26 = tpu.dynamic_rotate %25 by %c120_i32 dim 1 : vector<16x128xf32>, i32 -> vector<16x128xf32>
    %27 = arith.addf %24, %26 : vector<16x128xf32>
    %c0_3 = arith.constant 0 : index
    %c0_4 = arith.constant 0 : index
    %28 = vector.load %arg3[%c0_3, %c0_4] : memref<16x1xf32, #tpu.memory_space<vmem>>, vector<16x1xf32>
    %29 = vector.broadcast %28 : vector<16x1xf32> to vector<16x128xf32>
    %30 = arith.addf %27, %29 : vector<16x128xf32>
    %cst_5 = arith.constant 0.000000e+00 : f32
    %31 = vector.broadcast %cst_5 : f32 to vector<16x128xf32>
    %32 = arith.cmpf ogt, %30, %31 : vector<16x128xf32>
    %cst_6 = arith.constant 0.000000e+00 : f32
    %33 = vector.broadcast %cst_6 : f32 to vector<16x128xf32>
    %34 = arith.minimumf %30, %33 : vector<16x128xf32>
    %35 = math.exp %34 : vector<16x128xf32>
    %cst_7 = arith.constant 1.000000e+00 : f32
    %36 = vector.broadcast %cst_7 : f32 to vector<16x128xf32>
    %37 = arith.subf %35, %36 : vector<16x128xf32>
    %38 = arith.select %32, %30, %37 : vector<16x128xi1>, vector<16x128xf32>
    %c127_i32_8 = arith.constant 127 : i32
    %39 = tpu.dynamic_rotate %38 by %c127_i32_8 dim 1 : vector<16x128xf32>, i32 -> vector<16x128xf32>
    %40 = arith.addf %38, %39 : vector<16x128xf32>
    %c0_9 = arith.constant 0 : index
    %c0_10 = arith.constant 0 : index
    %41 = vector.load %arg6[%c0_9, %c0_10] : memref<1x128xf32, #tpu.memory_space<vmem>>, vector<1x128xf32>
    %42 = vector.broadcast %41 : vector<1x128xf32> to vector<16x128xf32>
    %43 = arith.mulf %40, %42 : vector<16x128xf32>
    %c0_11 = arith.constant 0 : index
    %c0_12 = arith.constant 0 : index
    %44 = vector.load %arg4[%c0_11, %c0_12] : memref<80x16xbf16, #tpu.memory_space<vmem>>, vector<80x16xbf16>
    %45 = arith.truncf %43 : vector<16x128xf32> to vector<16x128xbf16>
    %cst_13 = arith.constant dense<0.000000e+00> : vector<80x128xf32>
    %46 = tpu.matmul %44, %45, %cst_13 {dimension_numbers = #tpu.dot_dimension_numbers<[1], [0], [0], [1], [0, 0, 1, 1], [], []>} : vector<80x16xbf16>, vector<16x128xbf16>, vector<80x128xf32> -> vector<80x128xf32>
    %47 = vector.extract_strided_slice %46 {offsets = [0, 0], sizes = [16, 128], strides = [1, 1]} : vector<80x128xf32> to vector<16x128xf32>
    %c4_i32 = arith.constant 4 : i32
    %48 = tpu.dynamic_rotate %47 by %c4_i32 dim 1 : vector<16x128xf32>, i32 -> vector<16x128xf32>
    %49 = vector.extract_strided_slice %46 {offsets = [16, 0], sizes = [16, 128], strides = [1, 1]} : vector<80x128xf32> to vector<16x128xf32>
    %c2_i32 = arith.constant 2 : i32
    %50 = tpu.dynamic_rotate %49 by %c2_i32 dim 1 : vector<16x128xf32>, i32 -> vector<16x128xf32>
    %51 = arith.addf %48, %50 : vector<16x128xf32>
    %52 = vector.extract_strided_slice %46 {offsets = [32, 0], sizes = [16, 128], strides = [1, 1]} : vector<80x128xf32> to vector<16x128xf32>
    %53 = arith.addf %51, %52 : vector<16x128xf32>
    %54 = vector.extract_strided_slice %46 {offsets = [48, 0], sizes = [16, 128], strides = [1, 1]} : vector<80x128xf32> to vector<16x128xf32>
    %c126_i32_14 = arith.constant 126 : i32
    %55 = tpu.dynamic_rotate %54 by %c126_i32_14 dim 1 : vector<16x128xf32>, i32 -> vector<16x128xf32>
    %56 = arith.addf %53, %55 : vector<16x128xf32>
    %57 = vector.extract_strided_slice %46 {offsets = [64, 0], sizes = [16, 128], strides = [1, 1]} : vector<80x128xf32> to vector<16x128xf32>
    %c124_i32_15 = arith.constant 124 : i32
    %58 = tpu.dynamic_rotate %57 by %c124_i32_15 dim 1 : vector<16x128xf32>, i32 -> vector<16x128xf32>
    %59 = arith.addf %56, %58 : vector<16x128xf32>
    %c0_16 = arith.constant 0 : index
    %c0_17 = arith.constant 0 : index
    %60 = vector.load %arg5[%c0_16, %c0_17] : memref<16x1xf32, #tpu.memory_space<vmem>>, vector<16x1xf32>
    %61 = vector.broadcast %60 : vector<16x1xf32> to vector<16x128xf32>
    %62 = arith.addf %59, %61 : vector<16x128xf32>
    %cst_18 = arith.constant 0.000000e+00 : f32
    %63 = vector.broadcast %cst_18 : f32 to vector<16x128xf32>
    %64 = arith.cmpf ogt, %62, %63 : vector<16x128xf32>
    %cst_19 = arith.constant 0.000000e+00 : f32
    %65 = vector.broadcast %cst_19 : f32 to vector<16x128xf32>
    %66 = arith.minimumf %62, %65 : vector<16x128xf32>
    %67 = math.exp %66 : vector<16x128xf32>
    %cst_20 = arith.constant 1.000000e+00 : f32
    %68 = vector.broadcast %cst_20 : f32 to vector<16x128xf32>
    %69 = arith.subf %67, %68 : vector<16x128xf32>
    %70 = arith.select %64, %62, %69 : vector<16x128xi1>, vector<16x128xf32>
    %c0_21 = arith.constant 0 : index
    %c0_22 = arith.constant 0 : index
    %71 = vector.load %arg8[%c0_21, %c0_22] : memref<128x1xbf16, #tpu.memory_space<vmem>>, vector<128x1xbf16>
    %c0_23 = arith.constant 0 : index
    %c0_24 = arith.constant 0 : index
    %72 = vector.load %arg7[%c0_23, %c0_24] : memref<32x128xf32, #tpu.memory_space<vmem>>, vector<32x128xf32>
    %73 = vector.extract_strided_slice %72 {offsets = [0, 0], sizes = [16, 128], strides = [1, 1]} : vector<32x128xf32> to vector<16x128xf32>
    %74 = arith.mulf %70, %73 : vector<16x128xf32>
    %75 = arith.truncf %74 : vector<16x128xf32> to vector<16x128xbf16>
    %cst_25 = arith.constant dense<0.000000e+00> : vector<16x1xf32>
    %76 = tpu.matmul %75, %71, %cst_25 {dimension_numbers = #tpu.dot_dimension_numbers<[1], [0], [0], [1], [0, 0, 1, 1], [], []>} : vector<16x128xbf16>, vector<128x1xbf16>, vector<16x1xf32> -> vector<16x1xf32>
    %cst_26 = arith.constant dense<0.000000e+00> : vector<1xf32>
    %77 = vector.multi_reduction <add>, %76, %cst_26 [0] : vector<16x1xf32> to vector<1xf32>
    %78 = vector.shape_cast %77 : vector<1xf32> to vector<1x1xf32>
    %79 = vector.extract_strided_slice %72 {offsets = [16, 0], sizes = [16, 128], strides = [1, 1]} : vector<32x128xf32> to vector<16x128xf32>
    %80 = arith.mulf %70, %79 : vector<16x128xf32>
    %81 = arith.truncf %80 : vector<16x128xf32> to vector<16x128xbf16>
    %cst_27 = arith.constant dense<0.000000e+00> : vector<16x1xf32>
    %82 = tpu.matmul %81, %71, %cst_27 {dimension_numbers = #tpu.dot_dimension_numbers<[1], [0], [0], [1], [0, 0, 1, 1], [], []>} : vector<16x128xbf16>, vector<128x1xbf16>, vector<16x1xf32> -> vector<16x1xf32>
    %cst_28 = arith.constant dense<0.000000e+00> : vector<1xf32>
    %83 = vector.multi_reduction <add>, %82, %cst_28 [0] : vector<16x1xf32> to vector<1xf32>
    %84 = vector.shape_cast %83 : vector<1xf32> to vector<1x1xf32>
    %85 = tpu.concatenate %78, %84 in 0 : vector<1x1xf32>, vector<1x1xf32> -> vector<2x1xf32>
    %c0_29 = arith.constant 0 : index
    %c0_30 = arith.constant 0 : index
    %86 = vector.load %arg9[%c0_29, %c0_30] : memref<2x1xf32, #tpu.memory_space<vmem>>, vector<2x1xf32>
    %87 = arith.addf %85, %86 : vector<2x1xf32>
    %c0_31 = arith.constant 0 : index
    %c0_32 = arith.constant 0 : index
    %c0_33 = arith.constant 0 : index
    %88 = vector.load %arg10[%c0_31, %c0_32, %c0_33] : memref<1x2x1xf32, #tpu.memory_space<vmem>>, vector<1x2x1xf32>
    %89 = vector.shape_cast %88 : vector<1x2x1xf32> to vector<2x1xf32>
    %90 = vector.shape_cast %87 : vector<2x1xf32> to vector<1x2x1xf32>
    tpu.vector_store %arg10[%c0_31, %c0_32, %c0_33], %90 {strides = array<i32>} : memref<1x2x1xf32, #tpu.memory_space<vmem>>, vector<1x2x1xf32>,
    return
  }
  func.func @transform_0(%arg0: i32) -> (i32, i32) {
    %c0_i32 = arith.constant 0 : i32
    %c0_i32_0 = arith.constant 0 : i32
    return %c0_i32, %arg0 : i32, i32
  }
  func.func @transform_1(%arg0: i32) -> (i32, i32) {
    %c0_i32 = arith.constant 0 : i32
    %c0_i32_0 = arith.constant 0 : i32
    %c0_i32_1 = arith.constant 0 : i32
    return %c0_i32, %c0_i32_0 : i32, i32
  }
  func.func @transform_2(%arg0: i32) -> (i32, i32) {
    %c0_i32 = arith.constant 0 : i32
    %c0_i32_0 = arith.constant 0 : i32
    %c0_i32_1 = arith.constant 0 : i32
    return %c0_i32, %c0_i32_0 : i32, i32
  }
  func.func @transform_3(%arg0: i32) -> (i32, i32) {
    %c0_i32 = arith.constant 0 : i32
    %c0_i32_0 = arith.constant 0 : i32
    %c0_i32_1 = arith.constant 0 : i32
    return %c0_i32, %c0_i32_0 : i32, i32
  }
  func.func @transform_4(%arg0: i32) -> (i32, i32) {
    %c0_i32 = arith.constant 0 : i32
    %c0_i32_0 = arith.constant 0 : i32
    %c0_i32_1 = arith.constant 0 : i32
    return %c0_i32, %c0_i32_0 : i32, i32
  }
  func.func @transform_5(%arg0: i32) -> (i32, i32) {
    %c0_i32 = arith.constant 0 : i32
    %c0_i32_0 = arith.constant 0 : i32
    %c0_i32_1 = arith.constant 0 : i32
    return %c0_i32, %c0_i32_0 : i32, i32
  }
  func.func @transform_6(%arg0: i32) -> (i32, i32) {
    %c0_i32 = arith.constant 0 : i32
    %c0_i32_0 = arith.constant 0 : i32
    %c0_i32_1 = arith.constant 0 : i32
    return %c0_i32, %c0_i32_0 : i32, i32
  }
  func.func @transform_7(%arg0: i32) -> (i32, i32) {
    %c0_i32 = arith.constant 0 : i32
    %c0_i32_0 = arith.constant 0 : i32
    %c0_i32_1 = arith.constant 0 : i32
    return %c0_i32, %c0_i32_0 : i32, i32
  }
  func.func @transform_8(%arg0: i32) -> (i32, i32) {
    %c0_i32 = arith.constant 0 : i32
    %c0_i32_0 = arith.constant 0 : i32
    %c0_i32_1 = arith.constant 0 : i32
    return %c0_i32, %c0_i32_0 : i32, i32
  }
  func.func @transform_9(%arg0: i32) -> (i32, i32, i32) {
    %c0_i32 = arith.constant 0 : i32
    %c0_i32_0 = arith.constant 0 : i32
    %c0_i32_1 = arith.constant 0 : i32
    return %arg0, %c0_i32, %c0_i32_0 : i32, i32, i32
  }
}

</mosaic_0001>

<bundles_post_ra>
// kernel: trans_eegnet_forward.1
= control target key start
LH: loop header
LB: loop body
LE: loop exit
PB: predicated region body
PF: predicated region fallthrough
CT: control target
= control target key end

     0   :  { %s1495_s30 = smov 0   ;;  %s1497_s10 = smov 0   ;;  %s1753_s0 = inlined_call_operand.vmem [shape: bf16[62,256], index: 0, kind: input, shape index: {}]   ;;  %s1754_s1 = inlined_call_operand.vmem [shape: bf16[144,62], index: 1, kind: input, shape index: {}]   ;;  %s1755_s2 = inlined_call_operand.vmem [shape: f32[16,1], index: 2, kind: input, shape index: {}]   ;;  %s1756_s3 = inlined_call_operand.vmem [shape: bf16[80,16], index: 3, kind: input, shape index: {}]   ;;  %s1757_s4 = inlined_call_operand.vmem [shape: f32[16,1], index: 4, kind: input, shape index: {}]   ;;  %s1758_s5 = inlined_call_operand.vmem [shape: f32[1,128], index: 5, kind: input, shape index: {}]   ;;  %s1759_s6 = inlined_call_operand.vmem [shape: f32[32,128], index: 6, kind: input, shape index: {}]   ;;  %s1760_s7 = inlined_call_operand.vmem [shape: bf16[128,1], index: 7, kind: input, shape index: {}]   ;;  %s1761_s8 = inlined_call_operand.vmem [shape: f32[2,1], index: 8, kind: input, shape index: {}]   ;;  %s1762_s9 = inlined_call_operand.vmem [shape: f32[2,2,1], index: 9, kind: output, shape index: {}]  }
   0x1   :  { %s1499_s11 = smov 0  }
   0x2 LB: > { %s1136_s12 = sadd.s32 4294967295, %s1430_s11   ;;  %s1512_s13 = sadd.s32 1, %s1430_s11   ;;  %s1430_s11 = sphi %s1499_s11, %s1765_s11   ;;  %s1426_s10 = sphi %s1497_s10, %s1764_s10   ;;  %s1422_s30 = sphi %s1495_s30, %s1763_s30  }
   0x3   : > { %s23_s14 = ssub.s32 %s1430_s11, %s1512_s13  ;;  %s26_s15 = sadd.s32 1, %s1426_s10 }
   0x4   : > { %p24_p0 = scmp.eq.s32.totalorder %s23_s14, 0  ;;  %p33_p1 = scmp.ne.s32.totalorder %s1426_s10, %s1422_s30 }
   0x5   : > { %p34_p2 = scmp.eq.s32.totalorder %s1430_s11, 0  ;;  %p1139_p4 = scmp.ge.s32.totalorder %s1430_s11, 2 }
   0x6   : > { %s1521_s16 = scalar_select %p24_p0, %s1426_s10, %s26_s15  }
   0x7   : > { %p35_p3 = por %p34_p2, %p33_p1  ;;  %277 = sbr.rel (%p1139_p4) target bundleno = 23 (0x17), region = 48 }
   0xe   : > { %280 = sbr.rel (!%p35_p3) target bundleno = 23 (0x17), region = 52  ;;  %s282_s17 = sand.u32 (%p35_p3), 1, %s1426_s10  }
   0xf   : > { %s1141_s18 = sshll.u32 (%p35_p3), %s1430_s11, 2  ;;  %s1140_s19 = sshll.u32 (%p35_p3), %s282_s17, 5 }
  0x10   : > { %s286_s22 = scalar_lea.vmem (%p35_p3), %s1753_s0, %s1141_s18  ;;  %s284_s23 = scalar_lea.vmem (%p35_p3), [#allocation2], %s1140_s19 }
  0x11   : > { %v302_v0 = vld [vmem:[%s286_s22] sm:$0xf] (%p35_p3)  ;;  %v304_v1 = vld [vmem:[%s286_s22 + $0x8] sm:$0xf] (%p35_p3)  ;;  %v306_v2 = vld [vmem:[%s286_s22 + $0x10] sm:$0xf] (%p35_p3) }
  0x12   : > { %303 = vst [vmem:[%s284_s23] sm:$0xf] (%p35_p3), %v302_v0  ;;  %305 = vst [vmem:[%s284_s23 + $0x4] sm:$0xf] (%p35_p3), %v304_v1  ;;  %v308_v3 = vld [vmem:[%s286_s22 + $0x18] sm:$0xf] (%p35_p3) }
  0x13   : > { %v310_v4 = vld [vmem:[%s286_s22 + $0x20] sm:$0xf] (%p35_p3)  ;;  %307 = vst [vmem:[%s284_s23 + $0x8] sm:$0xf] (%p35_p3), %v306_v2  ;;  %309 = vst [vmem:[%s284_s23 + $0xc] sm:$0xf] (%p35_p3), %v308_v3 }
  0x14   : > { %311 = vst [vmem:[%s284_s23 + $0x10] sm:$0xf] (%p35_p3), %v310_v4  ;;  %v312_v5 = vld [vmem:[%s286_s22 + $0x28] sm:$0xf] (%p35_p3)  ;;  %v314_v6 = vld [vmem:[%s286_s22 + $0x30] sm:$0xf] (%p35_p3) }
  0x15   : > { %v316_v7 = vld [vmem:[%s286_s22 + $0x38] sm:$0xf]  ;;  %313 = vst [vmem:[%s284_s23 + $0x14] sm:$0xf] %v312_v5  ;;  %315 = vst [vmem:[%s284_s23 + $0x18] sm:$0xf] %v314_v6 }
  0x16   : > { %317 = vst [vmem:[%s284_s23 + $0x1c] sm:$0xf] %v316_v7 }
  0x17 PF: > { %p1142_p5 = scmp.ge.s32.totalorder %s1430_s11, 1  ;;  %p355_p6 = scmp.lt.s32.totalorder %s1430_s11, 3 }
  0x19   : > { %p356_p7 = pnand %p1142_p5, %p355_p6 }
  0x1a   : > { %s362_s24 = sand.u32 (!%p356_p7), 1, %s1422_s30   ;;  %v1432_v8 = vmov (!%p356_p7), 0.0   ;;  %vm1433_vm0 = vmmov (!%p356_p7), 0   ;;  %v1434_v10 = vmov (!%p356_p7), 0   ;;  %vm523_vm1 = vcmask (!%p356_p7), 1046528   ;;  %v680_v14 = vld [vmem:[%s1755_s2] sm:$0xff] (!%p356_p7) }
  0x1b   : > { %359 = sbr.rel (%p356_p7) target bundleno = 1236 (0x4d4), region = 93  ;;  %1229 = vmatprep.subr.bf16.mxu0 (!%p356_p7), %v1432_v8  ;;  %s1143_s25 = sshll.u32 (!%p356_p7), %s362_s24, 5  ;;  %1237 = vmatprep.mubr.msk.bf16.mxu0 (!%p356_p7), %vm1433_vm0, %v1432_v8  ;;  %vm495_vm2 = vcmask (!%p356_p7), 506880   ;;  %v1378_v16 = vld [vmem:[%s1754_s1] sm:$0xff] (!%p356_p7)   ;;  %v681_v17 = vld [vmem:[%s1755_s2 + $0x8] sm:$0xff] (!%p356_p7)  ;;  %v1380_v19 = vld [vmem:[%s1754_s1 + $0x10] sm:$0xff] (!%p356_p7)  }
  0x1c   : > { %1273 = vmatprep.subr.bf16.mxu1 (!%p356_p7), %v1432_v8  ;;  %1275 = vmatprep.mubr.msk.bf16.mxu1 (!%p356_p7), %vm1433_vm0, %v1432_v8  ;;  %s364_s26 = scalar_lea.vmem (!%p356_p7), [#allocation2], %s1143_s25  ;;  %v1379_v18 = vld [vmem:[%s1754_s1 + $0x8] sm:$0xff] (!%p356_p7)   ;;  %v1381_v20 = vld [vmem:[%s1754_s1 + $0x18] sm:$0xff] (!%p356_p7)   ;;  %v1382_v21 = vld [vmem:[%s1754_s1 + $0x20] sm:$0xff] (!%p356_p7)   ;;  %s1435_s17 = smov (!%p356_p7), 127   ;;  %vm757_vm5 = vcmask (!%p356_p7), 130048  }
  0x1d   : > { %v1374_v9 = vld [vmem:[%s364_s26] sm:$0xff] (!%p356_p7)   ;;  %1372 = vset.pattern.permute.xlu0 (!%p356_p7), %v1434_v10  ;;  %1373 = vset.pattern.permute.xlu1 (!%p356_p7), %v1434_v10  ;;  %v1375_v11 = vld [vmem:[%s364_s26 + $0x8] sm:$0xff] (!%p356_p7)   ;;  %v1376_v12 = vld [vmem:[%s364_s26 + $0x10] sm:$0xff] (!%p356_p7)   ;;  %s1436_s18 = smov (!%p356_p7), 126   ;;  %s1437_s19 = smov (!%p356_p7), 125   ;;  %vm1008_vm8 = vcmask (!%p356_p7), 7168  }
  0x1e   : > { %1230 = vmatpush3.bf16.msra.mxu0 (!%p356_p7), %v1374_v9  ;;  %v1377_v13 = vld [vmem:[%s364_s26 + $0x18] sm:$0x7f] (!%p356_p7)   ;;  %684 = vperm.xlu0 (!%p356_p7), %1372, %v680_v14   ;;  %v1383_v22 = vld [vmem:[%s1754_s1 + $0x28] sm:$0xff] (!%p356_p7)   ;;  %v1384_v23 = vld [vmem:[%s1754_s1 + $0x30] sm:$0xff] (!%p356_p7)   ;;  %s1438_s20 = smov (!%p356_p7), 124   ;;  %s1439_s21 = smov (!%p356_p7), 123  }
  0x1f   : > { %1231 = vmatprep.subr.bf16.mxu0 (!%p356_p7), %v1432_v8  ;;  %v525_v15 = vsel (!%p356_p7), %vm523_vm1, %v1377_v13, 0  ;;  %689 = vperm.xlu1 (!%p356_p7), %1373, %v681_v17   ;;  %v1385_v24 = vld [vmem:[%s1754_s1 + $0x38] sm:$0xff] (!%p356_p7)   ;;  %v1386_v25 = vld [vmem:[%s1754_s1 + $0x40] sm:$0xff] (!%p356_p7)   ;;  %s1440_s22 = smov (!%p356_p7), 122   ;;  %s1441_s23 = smov (!%p356_p7), 121   ;;  %vm1071_vm9 = vcmask (!%p356_p7), 1040384  }
  0x20   : > { %s1442_s24 = smov (!%p356_p7), 120   ;;  %s1443_s29 = smov (!%p356_p7), 4   ;;  %vm1075_vm10 = vcmask (!%p356_p7), 1024  }
  0x21   : > { %s1444_s30 = smov (!%p356_p7), 2   ;;  %p396_p8 = scmp.lt.s32.totalorder (!%p356_p7), %s1136_s12, 1 }
  0x22   : > { %1232 = vmatpush3.bf16.msra.mxu0 %v1375_v11 }
  0x23   : > { %1233 = vmatprep.subr.bf16.mxu0 %v1432_v8  ;;  %s1767_s12 = smov (!%p396_p8, %s1136_s12), 1 }
  0x26   : > { %1234 = vmatpush3.bf16.msra.mxu0 %v1376_v12 }
  0x27   : > { %1235 = vmatprep.subr.bf16.mxu0 %v1432_v8 }
  0x2a   : > { %1236 = vmatpush3.bf16.msra.mxu0 %v525_v15 }
  0x2d   : > { %1238 = vmatmul.mubr.msk.bf16.vlgmr.msra.gmra.mrb[0].mxu0 %vm495_vm2, %v1378_v16 }
  0x2e   : > { %1241 = vmatprep.mubr.msk.bf16.mxu0 %vm1433_vm0, %v1432_v8 }
  0x35   : > { %1242 = vmatmul.mubr.msk.bf16.gmra.mrb[4].mxu0 %vm495_vm2, %v1379_v18 }
  0x36   : > { %1245 = vmatprep.mubr.msk.bf16.mxu0 %vm1433_vm0, %v1432_v8 }
  0x3d   : > { %1246 = vmatmul.mubr.msk.bf16.gmra.mrb[8].mxu0 %vm495_vm2, %v1380_v19 }
  0x3e   : > { %1249 = vmatprep.mubr.msk.bf16.mxu0 %vm1433_vm0, %v1432_v8 }
  0x45   : > { %1250 = vmatmul.mubr.msk.bf16.gmra.mrb[12].mxu0 %vm495_vm2, %v1381_v20 }
  0x46   : > { %1253 = vmatprep.mubr.msk.bf16.mxu0 %vm1433_vm0, %v1432_v8 }
  0x4d   : > { %1254 = vmatmul.mubr.msk.bf16.gmra.mrb[16].mxu0 %vm495_vm2, %v1382_v21 }
  0x4e   : > { %1257 = vmatprep.mubr.msk.bf16.mxu0 %vm1433_vm0, %v1432_v8 }
  0x55   : > { %1258 = vmatmul.mubr.msk.bf16.gmra.mrb[20].mxu0 %vm495_vm2, %v1383_v22 }
  0x56   : > { %1261 = vmatprep.mubr.msk.bf16.mxu0 %vm1433_vm0, %v1432_v8 }
  0x5d   : > { %1262 = vmatmul.mubr.msk.bf16.gmra.mrb[24].mxu0 %vm495_vm2, %v1384_v23 }
  0x5e   : > { %1265 = vmatprep.mubr.msk.bf16.mxu0 %vm1433_vm0, %v1432_v8 }
  0x65   : > { %1266 = vmatmul.mubr.msk.bf16.gmra.mrb[28].mxu0 %vm495_vm2, %v1385_v24 }
  0x66   : > { %1269 = vmatprep.mubr.msk.bf16.mxu0 %vm1433_vm0, %v1432_v8 }
  0x6d   : > { %1270 = vmatmul.mubr.msk.bf16.gmra.mrb[32].mxu0 %vm495_vm2, %v1386_v25 }
  0x9d   : > { %v685_v63 = vpop.permute.xlu0 %684 }
  0x9e   : > { %v690_v62 = vpop.permute.xlu1 %689 }
 0x100   : > { %v1599_v26 = vpop.f32.mrb[0].mxu0 }
 0x101   : > { %v1239_v27 = vpop.f32.mrb[1].mxu0 }
 0x102   : > { %v1601_v28 = vpop.f32.mrb[2].mxu0 }
 0x103   : > { %v1240_v29 = vpop.f32.mrb[3].mxu0 }
 0x108   : > { %v569_v30 = vpop.f32.mrb[4].mxu0 }
 0x109   : > { %632 = vrot.lane.b32.xlu0 %v569_v30, %s1435_s17  ;;  %v1243_v31 = vpop.f32.mrb[5].mxu0 }
 0x10a   : > { %v572_v32 = vpop.f32.mrb[6].mxu0 }
 0x10b   : > { %v1244_v33 = vpop.f32.mrb[7].mxu0 }
 0x10d   : > { %634 = vrot.lane.b32.xlu0 %v572_v32, %s1435_s17 }
 0x110   : > { %v577_v34 = vpop.f32.mrb[8].mxu0 }
 0x111   : > { %638 = vrot.lane.b32.xlu1 %v577_v34, %s1436_s18  ;;  %v1247_v35 = vpop.f32.mrb[9].mxu0 }
 0x112   : > { %v580_v36 = vpop.f32.mrb[10].mxu0 }
 0x113   : > { %v1248_v37 = vpop.f32.mrb[11].mxu0 }
 0x115   : > { %640 = vrot.lane.b32.xlu1 %v580_v36, %s1436_s18 }
 0x118   : > { %v585_v38 = vpop.f32.mrb[12].mxu0 }
 0x119   : > { %644 = vrot.lane.b32.xlu0 %v585_v38, %s1437_s19  ;;  %v1251_v39 = vpop.f32.mrb[13].mxu0 }
 0x11a   : > { %v588_v40 = vpop.f32.mrb[14].mxu0 }
 0x11b   : > { %646 = vrot.lane.b32.xlu1 %v588_v40, %s1437_s19  ;;  %v1252_v41 = vpop.f32.mrb[15].mxu0 }
 0x120   : > { %v593_v42 = vpop.f32.mrb[16].mxu0 }
 0x121   : > { %650 = vrot.lane.b32.xlu0 %v593_v42, %s1438_s20  ;;  %v1255_v43 = vpop.f32.mrb[17].mxu0 }
 0x122   : > { %v596_v44 = vpop.f32.mrb[18].mxu0 }
 0x123   : > { %652 = vrot.lane.b32.xlu1 %v596_v44, %s1438_s20  ;;  %v1256_v45 = vpop.f32.mrb[19].mxu0 }
 0x124   : > { %v870_v45 = vld [vmem:[%s1757_s4] sm:$0xff] }
 0x128   : > { %v601_v46 = vpop.f32.mrb[20].mxu0 }
 0x129   : > { %656 = vrot.lane.b32.xlu0 %v601_v46, %s1439_s21  ;;  %v1259_v47 = vpop.f32.mrb[21].mxu0  ;;  %v871_v46 = vld [vmem:[%s1757_s4 + $0x8] sm:$0xff] }
 0x12a   : > { %v604_v48 = vpop.f32.mrb[22].mxu0 }
 0x12b   : > { %658 = vrot.lane.b32.xlu1 %v604_v48, %s1439_s21  ;;  %v1260_v49 = vpop.f32.mrb[23].mxu0 }
 0x12c   : > { %v1169_v49 = vld [vmem:[%s1758_s5] ss:$0 sm:$0xff] }
 0x130   : > { %v609_v50 = vpop.f32.mrb[24].mxu0 }
 0x131   : > { %662 = vrot.lane.b32.xlu1 %v609_v50, %s1440_s22  ;;  %v1263_v51 = vpop.f32.mrb[25].mxu0 }
 0x132   : > { %v612_v52 = vpop.f32.mrb[26].mxu0 }
 0x133   : > { %664 = vrot.lane.b32.xlu0 %v612_v52, %s1440_s22  ;;  %v1264_v53 = vpop.f32.mrb[27].mxu0 }
 0x138   : > { %v617_v54 = vpop.f32.mrb[28].mxu0 }
 0x139   : > { %668 = vrot.lane.b32.xlu1 %v617_v54, %s1441_s23  ;;  %v1267_v55 = vpop.f32.mrb[29].mxu0 }
 0x13a   : > { %v620_v56 = vpop.f32.mrb[30].mxu0  ;;  %v1387_v55 = vld [vmem:[%s1756_s3] sm:$0xff]  }
 0x13b   : > { %670 = vrot.lane.b32.xlu0 %v620_v56, %s1441_s23  ;;  %v1268_v57 = vpop.f32.mrb[31].mxu0  ;;  %v1388_v56 = vld [vmem:[%s1756_s3 + $0x8] sm:$0xff]   ;;  %s1144_s23 = sshll.u32 %s1767_s12, 1 }
 0x13c   : > { %v1389_v57 = vld [vmem:[%s1756_s3 + $0x10] sm:$0xff]   ;;  %s399_s27 = scalar_lea.vmem %s1762_s9, %s1144_s23 }
 0x140   : > { %v625_v58 = vpop.f32.mrb[32].mxu0 }
 0x141   : > { %674 = vrot.lane.b32.xlu1 %v625_v58, %s1442_s24  ;;  %v1271_v59 = vpop.f32.mrb[33].mxu0  ;;  %v1390_v58 = vld [vmem:[%s1756_s3 + $0x18] sm:$0xff]  }
 0x142   : > { %v628_v60 = vpop.f32.mrb[34].mxu0  ;;  %v1391_v59 = vld [vmem:[%s1756_s3 + $0x20] sm:$0xff]  }
 0x143   : > { %676 = vrot.lane.b32.xlu0 %v628_v60, %s1442_s24  ;;  %v1272_v61 = vpop.f32.mrb[35].mxu0  ;;  %v1651_v60 = vld [vmem:[%s1760_s7] sm:$0xff]  }
 0x17b   : > { %v633_v1 = vpop.permute.xlu0 %632 }
 0x17c   : > { %v636_v9 = vadd.f32 %v633_v1, %v1599_v26 }
 0x17f   : > { %v635_v3 = vpop.permute.xlu0 %634 }
 0x180   : > { %v637_v11 = vadd.f32 %v635_v3, %v1601_v28 }
 0x183   : > { %v639_v0 = vpop.permute.xlu1 %638 }
 0x184   : > { %v642_v12 = vadd.f32 %v639_v0, %v636_v9 }
 0x187   : > { %v641_v2 = vpop.permute.xlu1 %640 }
 0x188   : > { %v643_v14 = vadd.f32 %v641_v2, %v637_v11 }
 0x18b   : > { %v645_v5 = vpop.permute.xlu0 %644 }
 0x18c   : > { %v648_v15 = vadd.f32 %v645_v5, %v642_v12  ;;  %v1658_v5 = vld [vmem:[%s1760_s7 + $0x8] sm:$0xff]  }
 0x18d   : > { %v647_v4 = vpop.permute.xlu1 %646 }
 0x18e   : > { %v649_v17 = vadd.f32 %v647_v4, %v643_v14 }
 0x193   : > { %v651_v7 = vpop.permute.xlu0 %650 }
 0x194   : > { %v654_v18 = vadd.f32 %v651_v7, %v648_v15  ;;  %v1673_v15 = vld [vmem:[%s1760_s7 + $0x18] sm:$0xff]  }
 0x195   : > { %v653_v6 = vpop.permute.xlu1 %652 }
 0x196   : > { %v655_v20 = vadd.f32 %v653_v6, %v649_v17  ;;  %v1664_v6 = vld [vmem:[%s1760_s7 + $0x10] sm:$0xff]   ;;  %v1681_v17 = vld [vmem:[%s1760_s7 + $0x20] sm:$0xff]  }
 0x19b   : > { %v657_v13 = vpop.permute.xlu0 %656 }
 0x19c   : > { %v660_v21 = vadd.f32 %v657_v13, %v654_v18 }
 0x19d   : > { %v659_v10 = vpop.permute.xlu1 %658 }
 0x19e   : > { %v661_v23 = vadd.f32 %v659_v10, %v655_v20 }
 0x1a3   : > { %v663_v16 = vpop.permute.xlu1 %662 }
 0x1a4   : > { %v666_v24 = vadd.f32 %v663_v16, %v660_v21  ;;  %v1689_v21 = vld [vmem:[%s1760_s7 + $0x28] sm:$0xff]  }
 0x1a5   : > { %v665_v19 = vpop.permute.xlu0 %664 }
 0x1a6   : > { %v667_v27 = vadd.f32 %v665_v19, %v661_v23  ;;  %v1697_v23 = vld [vmem:[%s1760_s7 + $0x30] sm:$0xff]  }
 0x1ab   : > { %v669_v22 = vpop.permute.xlu1 %668 }
 0x1ac   : > { %v672_v29 = vadd.f32 %v669_v22, %v666_v24  ;;  %v1399_v24 = vld [vmem:[%s1760_s7 + $0x38] sm:$0xff]  }
 0x1ad   : > { %v671_v25 = vpop.permute.xlu0 %670 }
 0x1ae   : > { %v673_v30 = vadd.f32 %v671_v25, %v667_v27 }
 0x1b3   : > { %v675_v26 = vpop.permute.xlu1 %674 }
 0x1b4   : > { %v678_v31 = vadd.f32 %v675_v26, %v672_v29 }
 0x1b5   : > { %v677_v28 = vpop.permute.xlu0 %676 }
 0x1b6   : > { %v692_v32 = vadd.f32 %v685_v63, %v678_v31  ;;  %v679_v33 = vadd.f32 %v677_v28, %v673_v30 }
 0x1b8   : > { %v696_v34 = vmin.f32 %v692_v32, 0.0  ;;  %v693_v35 = vadd.f32 %v690_v62, %v679_v33  ;;  %vm694_vm3 = vcmp.gt.f32.partialorder %v692_v32, 0.0 }
 0x1ba   : > { %v698_v36 = vmul.f32 1.442695, %v696_v34  ;;  %v697_v37 = vmin.f32 %v693_v35, 0.0  ;;  %vm695_vm4 = vcmp.gt.f32.partialorder %v693_v35, 0.0 }
 0x1bc   : > { %1400 = vpow2.f32 %v698_v36  ;;  %v700_v38 = vmul.f32 1.442695, %v697_v37 }
 0x1be   : > { %1402 = vpow2.f32 %v700_v38 }
 0x1c6   : > { %v1401_v39 = vpop.eup %1400 }
 0x1c7   : > { %v1167_v40 = vadd.f32 -1.0, %v1401_v39 }
 0x1c8   : > { %v1403_v41 = vpop.eup %1402 }
 0x1c9   : > { %v704_v42 = vsel %vm694_vm3, %v692_v32, %v1167_v40  ;;  %v1168_v43 = vadd.f32 -1.0, %v1403_v41 }
 0x1ca   : > { %706 = vrot.lane.b32.xlu1 %v704_v42, %s1435_s17 }
 0x1cb   : > { %v705_v44 = vsel %vm695_vm4, %v693_v35, %v1168_v43 }
 0x1cc   : > { %708 = vrot.lane.b32.xlu0 %v705_v44, %s1435_s17 }
 0x1ce   : > { %874 = vperm.xlu1 %1373, %v870_v45  }
 0x1d0   : > { %879 = vperm.xlu0 %1372, %v871_v46  }
 0x23c   : > { %v707_v47 = vpop.permute.xlu1 %706 }
 0x23d   : > { %v710_v48 = vadd.f32 %v707_v47, %v704_v42 }
 0x23e   : > { %v709_v50 = vpop.permute.xlu0 %708 }
 0x23f   : > { %v711_v51 = vadd.f32 %v709_v50, %v705_v44  ;;  %v719_v52 = vmul.f32 %v1169_v49, %v710_v48 }
 0x241   : > { %v720_v53 = vmul.f32 %v1169_v49, %v711_v51 }
 0x243   : > { %v731_v54 = vpack.c.bf16 %v720_v53, %v719_v52  ;;  %v912_v52 = vld [vmem:[%s1759_s6] sm:$0xff]  ;;  %v914_v53 = vld [vmem:[%s1759_s6 + $0x10] sm:$0xff] }
 0x245   : > { %1274 = vmatpush3.bf16.msra.mxu1 %v731_v54 }
 0x246   : > { %1295 = vmatprep.subr.bf16.mxu1 %v1432_v8 }
 0x248   : > { %1276 = vmatmul.mubr.msk.bf16.vlgmr.msra.gmra.mrb[0].mxu1 %vm757_vm5, %v1387_v55  ;;  %v913_v55 = vld [vmem:[%s1759_s6 + $0x8] sm:$0xff] }
 0x249   : > { %1279 = vmatprep.mubr.msk.bf16.mxu1 %vm1433_vm0, %v1432_v8  ;;  %1296 = vmatpush3.bf16.msra.mxu1 %v1651_v60 }
 0x24a   : > { %1297 = vmatprep.subr.bf16.mxu1 %v1432_v8 }
 0x24d   : > { %1298 = vmatpush3.bf16.msra.mxu1 %v1658_v5  ;;  %v875_v25 = vpop.permute.xlu1 %874 }
 0x24e   : > { %1299 = vmatprep.subr.bf16.mxu1 %v1432_v8 }
 0x24f   : > { %v880_v27 = vpop.permute.xlu0 %879 }
 0x250   : > { %1280 = vmatmul.mubr.msk.bf16.gmra.mrb[4].mxu1 %vm757_vm5, %v1388_v56  ;;  %v915_v56 = vld [vmem:[%s1759_s6 + $0x18] sm:$0xff] }
 0x251   : > { %1283 = vmatprep.mubr.msk.bf16.mxu1 %vm1433_vm0, %v1432_v8  ;;  %1300 = vmatpush3.bf16.msra.mxu1 %v1664_v6 }
 0x252   : > { %1301 = vmatprep.subr.bf16.mxu1 %v1432_v8 }
 0x255   : > { %1302 = vmatpush3.bf16.msra.mxu1 %v1673_v15 }
 0x256   : > { %1303 = vmatprep.subr.bf16.mxu1 %v1432_v8 }
 0x258   : > { %1284 = vmatmul.mubr.msk.bf16.gmra.mrb[8].mxu1 %vm757_vm5, %v1389_v57 }
 0x259   : > { %1287 = vmatprep.mubr.msk.bf16.mxu1 %vm1433_vm0, %v1432_v8  ;;  %1304 = vmatpush3.bf16.msra.mxu1 %v1681_v17 }
 0x25a   : > { %1305 = vmatprep.subr.bf16.mxu1 %v1432_v8 }
 0x25d   : > { %1306 = vmatpush3.bf16.msra.mxu1 %v1689_v21 }
 0x25e   : > { %1307 = vmatprep.subr.bf16.mxu1 %v1432_v8 }
 0x260   : > { %1288 = vmatmul.mubr.msk.bf16.gmra.mrb[12].mxu1 %vm757_vm5, %v1390_v58 }
 0x261   : > { %1291 = vmatprep.mubr.msk.bf16.mxu1 %vm1433_vm0, %v1432_v8  ;;  %1308 = vmatpush3.bf16.msra.mxu1 %v1697_v23 }
 0x262   : > { %1309 = vmatprep.subr.bf16.mxu1 %v1432_v8 }
 0x265   : > { %1310 = vmatpush3.bf16.msra.mxu1 %v1399_v24 }
 0x266   : > { %1315 = vmatprep.subr.bf16.mxu1 %v1432_v8 }
 0x268   : > { %1292 = vmatmul.mubr.msk.bf16.gmra.mrb[16].mxu1 %vm757_vm5, %v1391_v59 }
 0x269   : > { %1311 = vmatprep.mubr.msk.bf16.mxu1 %vm1433_vm0, %v1432_v8 }
 0x31b   : > { %v807_v61 = vpop.f32.mrb[0].mxu1 }
 0x31c   : > { %846 = vrot.lane.b32.xlu1 %v807_v61, %s1443_s29  ;;  %v1277_v62 = vpop.f32.mrb[1].mxu1 }
 0x31d   : > { %v810_v63 = vpop.f32.mrb[2].mxu1 }
 0x31e   : > { %848 = vrot.lane.b32.xlu0 %v810_v63, %s1443_s29  ;;  %v1278_v0 = vpop.f32.mrb[3].mxu1 }
 0x323   : > { %v815_v1 = vpop.f32.mrb[4].mxu1 }
 0x324   : > { %850 = vrot.lane.b32.xlu1 %v815_v1, %s1444_s30  ;;  %v1281_v2 = vpop.f32.mrb[5].mxu1 }
 0x325   : > { %v818_v3 = vpop.f32.mrb[6].mxu1 }
 0x326   : > { %852 = vrot.lane.b32.xlu0 %v818_v3, %s1444_s30  ;;  %v1282_v4 = vpop.f32.mrb[7].mxu1 }
 0x32b   : > { %v823_v7 = vpop.f32.mrb[8].mxu1 }
 0x32c   : > { %v1285_v9 = vpop.f32.mrb[9].mxu1 }
 0x32d   : > { %v826_v10 = vpop.f32.mrb[10].mxu1 }
 0x32e   : > { %v1286_v11 = vpop.f32.mrb[11].mxu1 }
 0x333   : > { %v831_v12 = vpop.f32.mrb[12].mxu1 }
 0x334   : > { %858 = vrot.lane.b32.xlu1 %v831_v12, %s1436_s18  ;;  %v1289_v13 = vpop.f32.mrb[13].mxu1 }
 0x335   : > { %v834_v14 = vpop.f32.mrb[14].mxu1 }
 0x336   : > { %860 = vrot.lane.b32.xlu0 %v834_v14, %s1436_s18  ;;  %v1290_v16 = vpop.f32.mrb[15].mxu1 }
 0x33b   : > { %v839_v18 = vpop.f32.mrb[16].mxu1 }
 0x33c   : > { %864 = vrot.lane.b32.xlu1 %v839_v18, %s1438_s20  ;;  %v1293_v19 = vpop.f32.mrb[17].mxu1 }
 0x33d   : > { %v842_v20 = vpop.f32.mrb[18].mxu1 }
 0x33e   : > { %866 = vrot.lane.b32.xlu0 %v842_v20, %s1438_s20  ;;  %v1294_v22 = vpop.f32.mrb[19].mxu1 }
 0x38e   : > { %v847_v29 = vpop.permute.xlu1 %846 }
 0x390   : > { %v849_v26 = vpop.permute.xlu0 %848 }
 0x396   : > { %v851_v30 = vpop.permute.xlu1 %850 }
 0x397   : > { %v854_v28 = vadd.f32 %v851_v30, %v847_v29  ;;  %v1073_v29 = vld [vmem:[%s1761_s8] sm:$0x3] }
 0x398   : > { %v853_v31 = vpop.permute.xlu0 %852 }
 0x399   : > { %v855_v32 = vadd.f32 %v853_v31, %v849_v26  ;;  %v856_v34 = vadd.f32 %v854_v28, %v823_v7 }
 0x39b   : > { %v857_v37 = vadd.f32 %v855_v32, %v826_v10 }
 0x3a6   : > { %v859_v33 = vpop.permute.xlu1 %858 }
 0x3a7   : > { %v862_v36 = vadd.f32 %v859_v33, %v856_v34 }
 0x3a8   : > { %v861_v35 = vpop.permute.xlu0 %860 }
 0x3a9   : > { %v863_v39 = vadd.f32 %v861_v35, %v857_v37 }
 0x3ae   : > { %v865_v38 = vpop.permute.xlu1 %864 }
 0x3af   : > { %v868_v40 = vadd.f32 %v865_v38, %v862_v36 }
 0x3b0   : > { %v867_v41 = vpop.permute.xlu0 %866 }
 0x3b1   : > { %v882_v42 = vadd.f32 %v875_v25, %v868_v40  ;;  %v869_v43 = vadd.f32 %v867_v41, %v863_v39 }
 0x3b3   : > { %v886_v44 = vmin.f32 %v882_v42, 0.0  ;;  %v883_v45 = vadd.f32 %v880_v27, %v869_v43  ;;  %vm884_vm6 = vcmp.gt.f32.partialorder %v882_v42, 0.0 }
 0x3b5   : > { %v888_v46 = vmul.f32 1.442695, %v886_v44  ;;  %v887_v47 = vmin.f32 %v883_v45, 0.0  ;;  %vm885_vm7 = vcmp.gt.f32.partialorder %v883_v45, 0.0 }
 0x3b7   : > { %1404 = vpow2.f32 %v888_v46  ;;  %v890_v48 = vmul.f32 1.442695, %v887_v47 }
 0x3b9   : > { %1406 = vpow2.f32 %v890_v48 }
 0x3c1   : > { %v1405_v49 = vpop.eup %1404 }
 0x3c2   : > { %v1180_v50 = vadd.f32 -1.0, %v1405_v49 }
 0x3c3   : > { %v1407_v51 = vpop.eup %1406 }
 0x3c4   : > { %v894_v54 = vsel %vm884_vm6, %v882_v42, %v1180_v50  ;;  %v1181_v57 = vadd.f32 -1.0, %v1407_v51 }
 0x3c5   : > { %v916_v59 = vmul.f32 %v912_v52, %v894_v54  ;;  %v1018_v61 = vmul.f32 %v914_v53, %v894_v54 }
 0x3c6   : > { %v895_v58 = vsel %vm885_vm7, %v883_v45, %v1181_v57 }
 0x3c7   : > { %v917_v62 = vmul.f32 %v913_v55, %v895_v58  ;;  %v1019_v63 = vmul.f32 %v915_v56, %v895_v58 }
 0x3c9   : > { %v918_v0 = vpack.c.bf16 %v917_v62, %v916_v59  ;;  %v1020_v1 = vpack.c.bf16 %v1019_v63, %v1018_v61 }
 0x3cb   : > { %1312 = vmatmul.mubr.bf16.vlgmr.msra.gmra.mrb[20].mxu1 %v918_v0 }
 0x3cc   : > { %1316 = vmatpush3.bf16.msra.mxu1 %v1651_v60  ;;  %1331 = vmatprep.mubr.msk.bf16.mxu1 %vm1433_vm0, %v1432_v8 }
 0x3cd   : > { %1317 = vmatprep.subr.bf16.mxu1 %v1432_v8 }
 0x3d0   : > { %1318 = vmatpush3.bf16.msra.mxu1 %v1658_v5 }
 0x3d1   : > { %1319 = vmatprep.subr.bf16.mxu1 %v1432_v8 }
 0x3d4   : > { %1320 = vmatpush3.bf16.msra.mxu1 %v1664_v6 }
 0x3d5   : > { %1321 = vmatprep.subr.bf16.mxu1 %v1432_v8 }
 0x3d8   : > { %1322 = vmatpush3.bf16.msra.mxu1 %v1673_v15 }
 0x3d9   : > { %1323 = vmatprep.subr.bf16.mxu1 %v1432_v8 }
 0x3dc   : > { %1324 = vmatpush3.bf16.msra.mxu1 %v1681_v17 }
 0x3dd   : > { %1325 = vmatprep.subr.bf16.mxu1 %v1432_v8 }
 0x3e0   : > { %1326 = vmatpush3.bf16.msra.mxu1 %v1689_v21 }
 0x3e1   : > { %1327 = vmatprep.subr.bf16.mxu1 %v1432_v8 }
 0x3e4   : > { %1328 = vmatpush3.bf16.msra.mxu1 %v1697_v23 }
 0x3e5   : > { %1329 = vmatprep.subr.bf16.mxu1 %v1432_v8 }
 0x3e8   : > { %1330 = vmatpush3.bf16.msra.mxu1 %v1399_v24 }
 0x3eb   : > { %1332 = vmatmul.mubr.bf16.vlgmr.msra.gmra.mrb[24].mxu1 %v1020_v1 }
 0x49e   : > { %v1001_v60 = vpop.f32.mrb[20].mxu1 }
 0x49f   : > { %v1313_v2 = vpop.f32.mrb[21].mxu1  ;;  %v1009_v4 = vsel %vm1008_vm8, %v1001_v60, 0.0 }
 0x4a0   : > { %v1004_v3 = vpop.f32.mrb[22].mxu1 }
 0x4a1   : > { %v1010_v5 = vsel %vm1008_vm8, %v1004_v3, 0.0  ;;  %v1314_v6 = vpop.f32.mrb[23].mxu1 }
 0x4a2   : > { %v1011_v7 = vadd.f32 %v1010_v5, %v1009_v4 }
 0x4a4   : > { %v1012_v9 = vrot.slane %v1011_v7, 4 }
 0x4a6   : > { %v1013_v10 = vadd.f32 %v1012_v9, %v1011_v7 }
 0x4a8   : > { %v1014_v16 = vrot.slane %v1013_v10, 2 }
 0x4aa   : > { %v1015_v19 = vadd.f32 %v1014_v16, %v1013_v10 }
 0x4ac   : > { %v1016_v22 = vrot.slane %v1015_v19, 1 }
 0x4ae   : > { %v1017_v25 = vadd.f32 %v1016_v22, %v1015_v19 }
 0x4be   : > { %v1055_v11 = vpop.f32.mrb[24].mxu1 }
 0x4bf   : > { %v1333_v12 = vpop.f32.mrb[25].mxu1  ;;  %v1062_v14 = vsel %vm1008_vm8, %v1055_v11, 0.0 }
 0x4c0   : > { %v1058_v13 = vpop.f32.mrb[26].mxu1 }
 0x4c1   : > { %v1063_v15 = vsel %vm1008_vm8, %v1058_v13, 0.0  ;;  %v1334_v8 = vpop.f32.mrb[27].mxu1 }
 0x4c2   : > { %v1064_v17 = vadd.f32 %v1063_v15, %v1062_v14 }
 0x4c4   : > { %v1065_v18 = vrot.slane %v1064_v17, 4 }
 0x4c6   : > { %v1066_v20 = vadd.f32 %v1065_v18, %v1064_v17 }
 0x4c8   : > { %v1067_v21 = vrot.slane %v1066_v20, 2 }
 0x4ca   : > { %v1068_v23 = vadd.f32 %v1067_v21, %v1066_v20 }
 0x4cc   : > { %v1069_v24 = vrot.slane %v1068_v23, 1 }
 0x4ce   : > { %v1070_v27 = vadd.f32 %v1069_v24, %v1068_v23 }
 0x4d0   : > { %v1072_v26 = vsel %vm1071_vm9, %v1017_v25, %v1070_v27 }
 0x4d1   : > { %v1074_v30 = vadd.f32 %v1073_v29, %v1072_v26 }
 0x4d3   : > { %1076 = vst.msk [vmem:[%s399_s27] sm:$0x3] %vm1075_vm10, %v1074_v30 }
 0x4d4 PF: > { %p16_p9 = scmp.ge.s32.totalorder %s1512_s13, 4   ;;  %s1763_s30 = smov %s1426_s10 }
 0x4d5   : > { %s1764_s10 = smov %s1521_s16  ;;  %s1765_s11 = smov %s1512_s13 }
 0x4d6   :  { %18 = sbr.rel (!%p16_p9) target bundleno = 2 (0x2), region = 132 }

</bundles_post_ra>
